<compile_context>
chip_gen: v7x
topology: tpu7x:2x2x1
jax: 0.10.0
libtpu: 0.0.40
codegen_flags: <defaults>
</compile_context>

<pallas_src>
import jax
import jax.numpy as jnp
from jax.experimental import pallas as pl
from jax.experimental.pallas import tpu as pltpu

TN = 256  # N-tile: 4 steps over the padded 1024 outputs, multiple of 128 lanes


def _linear_kernel(x_ref, w_ref, b_ref, o_ref):
    # x_ref: (B, K) f32, w_ref: (TN, K) f32, b_ref: (1, TN) f32, o_ref: (B, TN) f32
    # Contract x's dim 1 with w's dim 1 (i.e. x @ w.T) without materializing w.T.
    acc = jax.lax.dot_general(
        x_ref[...],
        w_ref[...],
        dimension_numbers=(((1,), (1,)), ((), ())),
        preferred_element_type=jnp.float32,
    )
    o_ref[...] = (acc + b_ref[...]).astype(o_ref.dtype)


def prepare_params(weight, bias, tile_n=TN):
    """One-time (init-time) glue: zero-pad N to a multiple of the N tile.

    weight: (N, K) f32, bias: (N,) f32  ->  (N_pad, K), (1, N_pad)
    """
    N, K = weight.shape
    n_pad = pl.cdiv(N, tile_n) * tile_n - N
    w_p = jnp.pad(weight, ((0, n_pad), (0, 0)))
    b_p = jnp.pad(bias, (0, n_pad)).reshape(1, N + n_pad)
    return w_p, b_p


def linear_pallas(x2d, weight_padded, bias_padded_2d, n_out):
    """x2d: (B, K) f32, weight_padded: (N_pad, K) f32, bias_padded_2d: (1, N_pad) f32
    -> (B, n_out) f32."""
    B, K = x2d.shape
    N_pad, Kw = weight_padded.shape
    assert K == Kw
    assert N_pad % TN == 0
    n_tiles = N_pad // TN

    out_padded = pl.pallas_call(
        _linear_kernel,
        out_shape=jax.ShapeDtypeStruct((B, N_pad), jnp.float32),
        grid=(n_tiles,),
        in_specs=[
            pl.BlockSpec((B, K), lambda j: (0, 0)),     # activations: whole, resident
            pl.BlockSpec((TN, K), lambda j: (j, 0)),    # weight: stream N-tiles
            pl.BlockSpec((1, TN), lambda j: (0, j)),    # bias tile
        ],
        out_specs=pl.BlockSpec((B, TN), lambda j: (0, j)),
        compiler_params=pltpu.CompilerParams(
            dimension_semantics=("parallel",),  # shards weight stream across TCs (v7x)
        ),
        cost_estimate=pl.CostEstimate(
            flops=2 * B * K * N_pad,
            transcendentals=0,
            bytes_accessed=(N_pad * K + B * K + B * N_pad + N_pad) * 4,
        ),
    )(x2d, weight_padded, bias_padded_2d)

    # Slice the zero-padded columns back off (pure view/slice glue).
    return out_padded[:, :n_out]


def mod_forward(x_nchw, weight_padded, bias_padded_2d, n_out):
    # torch.flatten(x, 1)
    B = x_nchw.shape[0]
    x2d = x_nchw.reshape(B, -1)
    return linear_pallas(x2d, weight_padded, bias_padded_2d, n_out)


if __name__ == "__main__":
    key = jax.random.PRNGKey(0)
    kx, kw, kb = jax.random.split(key, 3)

    # Input: (B, C, H, W) with C*H*W = 1024 (matches nn.Linear(1024, 1000))
    B, C, H, W = 2, 4, 16, 16
    x = jax.random.normal(kx, (B, C, H, W), dtype=jnp.float32)

    # Deterministic parameter init (shapes from nn.Linear(1024, 1000))
    in_features, out_features = 1024, 1000
    bound = 1.0 / (in_features ** 0.5)
    weight = jax.random.uniform(
        kw, (out_features, in_features), minval=-bound, maxval=bound, dtype=jnp.float32
    )
    bias = jax.random.uniform(
        kb, (out_features,), minval=-bound, maxval=bound, dtype=jnp.float32
    )

    # One-time param prep (outside the per-step path): pad N to 1024.
    w_pad, b_pad = prepare_params(weight, bias)
    w_pad = jax.block_until_ready(w_pad)
    b_pad = jax.block_until_ready(b_pad)

    out = mod_forward(x, w_pad, b_pad, out_features)
    out = jax.block_until_ready(out)

    # Sanity check vs plain-JAX reference
    ref = x.reshape(B, -1) @ weight.T + bias
    assert out.shape == (B, out_features)
    assert jnp.allclose(out, ref, atol=1e-4, rtol=1e-4)

    print("KERNEL_OK")
</pallas_src>

<mosaic_0001>
module attributes {stable_mosaic.version = 11 : i64} {
  func.func @_linear_kernel(%arg0: i32, %arg1: memref<2x1024xf32, #tpu.memory_space<vmem>>, %arg2: memref<256x1024xf32, #tpu.memory_space<vmem>>, %arg3: memref<1x256xf32, #tpu.memory_space<vmem>>, %arg4: memref<2x256xf32, #tpu.memory_space<vmem>>) attributes {dimension_semantics = [#tpu.dimension_semantics<parallel>], iteration_bounds = array<i64: 4>, scalar_prefetch = 0 : i64, scratch_operands = 0 : i64, tpu.core_type = #tpu.core_type<tc>, window_params = [{pipeline_mode = #tpu.pipeline_mode<synchronous>, transform_indices = @transform_0, window_bounds = array<i64: 2, 1024>}, {transform_indices = @transform_1, window_bounds = array<i64: 256, 1024>}, {transform_indices = @transform_2, window_bounds = array<i64: 1, 256>}, {transform_indices = @transform_3, window_bounds = array<i64: 2, 256>}]} {
    %c0 = arith.constant 0 : index
    %c0_0 = arith.constant 0 : index
    %0 = vector.load %arg1[%c0, %c0_0] : memref<2x1024xf32, #tpu.memory_space<vmem>>, vector<2x1024xf32>
    %c0_1 = arith.constant 0 : index
    %c0_2 = arith.constant 0 : index
    %1 = vector.load %arg2[%c0_1, %c0_2] : memref<256x1024xf32, #tpu.memory_space<vmem>>, vector<256x1024xf32>
    %cst = arith.constant dense<0.000000e+00> : vector<2x256xf32>
    %2 = tpu.matmul %0, %1, %cst {dimension_numbers = #tpu.dot_dimension_numbers<[1], [1], [0], [0], [0, 0, 1, 0], [], []>} : vector<2x1024xf32>, vector<256x1024xf32>, vector<2x256xf32> -> vector<2x256xf32>
    %c0_3 = arith.constant 0 : index
    %c0_4 = arith.constant 0 : index
    %3 = vector.load %arg3[%c0_3, %c0_4] : memref<1x256xf32, #tpu.memory_space<vmem>>, vector<1x256xf32>
    %4 = vector.broadcast %3 : vector<1x256xf32> to vector<2x256xf32>
    %5 = arith.addf %2, %4 : vector<2x256xf32>
    %c0_5 = arith.constant 0 : index
    %c0_6 = arith.constant 0 : index
    %6 = vector.load %arg4[%c0_5, %c0_6] : memref<2x256xf32, #tpu.memory_space<vmem>>, vector<2x256xf32>
    tpu.vector_store %arg4[%c0_5, %c0_6], %5 {strides = array<i32>} : memref<2x256xf32, #tpu.memory_space<vmem>>, vector<2x256xf32>,
    return
  }
  func.func @transform_0(%arg0: i32) -> (i32, i32) {
    %c0_i32 = arith.constant 0 : i32
    %c0_i32_0 = arith.constant 0 : i32
    %c0_i32_1 = arith.constant 0 : i32
    return %c0_i32, %c0_i32_0 : i32, i32
  }
  func.func @transform_1(%arg0: i32) -> (i32, i32) {
    %c0_i32 = arith.constant 0 : i32
    %c0_i32_0 = arith.constant 0 : i32
    return %arg0, %c0_i32 : i32, i32
  }
  func.func @transform_2(%arg0: i32) -> (i32, i32) {
    %c0_i32 = arith.constant 0 : i32
    %c0_i32_0 = arith.constant 0 : i32
    return %c0_i32, %arg0 : i32, i32
  }
  func.func @transform_3(%arg0: i32) -> (i32, i32) {
    %c0_i32 = arith.constant 0 : i32
    %c0_i32_0 = arith.constant 0 : i32
    return %c0_i32, %arg0 : i32, i32
  }
}

</mosaic_0001>

<bundles_post_ra>
// kernel: tpu_custom_call.1
= control target key start
LH: loop header
LB: loop body
LE: loop exit
PB: predicated region body
PF: predicated region fallthrough
CT: control target
= control target key end

     0   :  { %8 = vsyncpa [#allocation3], 0  ;;  %s2045_s0 = inlined_call_operand.hbm [shape: f32[2,1024], index: 0, kind: input, shape index: {}]   ;;  %s2046_s1 = inlined_call_operand.hbm [shape: f32[1024,1024], index: 1, kind: input, shape index: {}]   ;;  %s2047_s2 = inlined_call_operand.hbm [shape: f32[1,1024], index: 2, kind: input, shape index: {}]   ;;  %s2048_s3 = inlined_call_operand.hbm [shape: f32[2,1024], index: 3, kind: output, shape index: {}]  }
   0x1   :  { %9 = vsyncpa [#allocation6], 0 }
   0x2   :  { %11 = vsyncpa [#allocation6 + $0x1], 0 }
   0x3   :  { %12 = vsyncpa [#allocation4], 0 }
   0x4   :  { %14 = vsyncpa [#allocation4 + $0x1], 0  ;;  %s1512_s12 = smov 0   ;;  %s1514_s13 = smov 0  }
   0x5   :  { %s1516_s14 = smov 0   ;;  %s1518_s15 = smov 0  }
   0x6 LB: > { %s1533_s16 = sadd.s32 1, %s1483_s15   ;;  %s48_s17 = sadd.s32 1, %s1479_s14  ;;  %s1483_s15 = sphi %s1518_s15, %s2070_s15   ;;  %s1479_s14 = sphi %s1516_s14, %s2069_s14   ;;  %s1475_s13 = sphi %s1514_s13, %s2068_s13   ;;  %s1471_s12 = sphi %s1512_s12, %s2067_s12  }
   0x7   : > { %s45_s18 = ssub.s32 %s1483_s15, %s1533_s16  ;;  %p55_p0 = scmp.ne.s32.totalorder %s1479_s14, %s1475_s13 }
   0x8   : > { %p46_p1 = scmp.eq.s32.totalorder %s45_s18, 0  ;;  %p56_p2 = scmp.eq.s32.totalorder %s1483_s15, 0 }
   0x9   : > { %p1284_p3 = scmp.lt.s32.totalorder %s1483_s15, 4  ;;  %s148_s20 = sand.u32 1, %s1483_s15  }
   0xa   : > { %s1543_s19 = scalar_select %p46_p1, %s1479_s14, %s48_s17  }
   0xb   : > { %p57_p4 = por %p56_p2, %p55_p0  ;;  %s150_s21 = sand.u32 1, %s1479_s14  }
   0xc   : > { %s972_s22 = sshll.u32 %s150_s21, 11  ;;  %s991_s23 = sshll.u32 %s1483_s15, 15 }
   0xd   : > { %s1556_s26 = scalar_lea.hbm %s2046_s1, %s991_s23  ;;  %s152_s27 = scalar_lea.vmem [#allocation5], %s972_s22 }
   0xe   : > { %s160_s28 = sshll.u32 %s152_s27, 4  ;;  %p1558_p5 = pnand %p1284_p3, %p57_p4  ;;  %s1562_s28 = int_to_ptr.vmem [resolvable:$true] %s160_s28 }
   0xf   : > { %s1564_s30 = scalar_lea.sflag [#allocation6], %s148_s20  ;;  %s1325_s4 = scalar_lea.hbm %s1556_s26, 32768 }
  0x10   : > { %p1326_p6 = scmp.ne.s32.totalorder %s1556_s26, %s1325_s4  ;;  %p1327_p7 = pneg %p1558_p5 }
  0x11   : > { %s1330_s7 = scalar_lea.hbm %s2046_s1, 131072  ;;  %p1331_p10 = scmp.lt.u32.totalorder %s1556_s26, %s2046_s1 }
  0x12   : > { %p1328_p8 = pnand %p1327_p7, %p1326_p6  ;;  %p1332_p11 = scmp.lt.u32.totalorder %s1330_s7, %s1325_s4 }
  0x13   : > { %p1334_p13 = scmp.lt.u32.totalorder %s1325_s4, %s1556_s26 }
  0x14   : > { %p1329_p9 = pneg %p1328_p8  ;;  %p1333_p12 = por %p1332_p11, %p1331_p10 }
  0x16   : > { %p1335_p1 = por %p1334_p13, %p1333_p12 }
  0x18   : > { %p1336_p2 = pnand %p1335_p1, %p1329_p9 }
  0x1a   : > { %1339 = shalt.err (!%p1336_p2)
}
  0x1b   : > { %s1340_s10 = scalar_lea.vmem %s1562_s28, 32768  ;;  %s1485_s11 = smov [#allocation5]  }
  0x1c   : > { %p1341_p3 = scmp.ne.s32.totalorder %s1562_s28, %s1340_s10  ;;  %s1345_s17 = sshll.u32 %s1485_s11, 4  ;;  %s1346_s17 = int_to_ptr.vmem [resolvable:$false] %s1345_s17 }
  0x1d   : > { %s1347_s18 = scalar_lea.vmem %s1346_s17, 65536  ;;  %p1348_p8 = scmp.lt.s32.totalorder %s1562_s28, %s1346_s17 }
  0x1e   : > { %p1343_p4 = pnand %p1341_p3, %p1327_p7  ;;  %p1349_p10 = scmp.lt.s32.totalorder %s1347_s18, %s1340_s10 }
  0x20   : > { %p1344_p6 = pneg %p1343_p4  ;;  %p1350_p11 = por %p1349_p10, %p1348_p8 }
  0x22   : > { %p1351_p12 = pnand %p1350_p11, %p1344_p6 }
  0x24   : > { %1354 = shalt.err (!%p1351_p12)
}
  0x25   : > { %s1486_s20 = smov 1024   ;;  %s1487_s22 = smov 64  }
  0x26   : > { %1275 = dma.hbm_to_vmem [thread:$0]  (!%p1558_p5), %s1556_s26, 32768, %s1562_s28, %s1564_s30, %s1486_s20, %s1486_s20, %s1487_s22  }
  0x27   : > { %s1593_s23 = sadd.s32 4294967295, %s1483_s15   ;;  %s968_s24 = sadd.s32 4294967294, %s1483_s15  }
  0x28   : > { %p61_p9 = scmp.ne.s32.totalorder %s1475_s13, %s1471_s12  ;;  %p2049_p13 = scmp.eq.s32.totalorder %s1593_s23, 0 }
  0x29   : > { %p111_p1 = scmp.eq.s32.totalorder %s1593_s23, 3  ;;  %p117_p2 = scmp.eq.s32.totalorder %s968_s24, 3 }
  0x2a   : > { %p1602_p3 = por %p2049_p13, %p61_p9  ;;  %p969_p4 = scmp.ge.s32.totalorder %s1483_s15, 1 }
  0x2b   : > { %p1610_p6 = por %p111_p1, %p55_p0  ;;  %p1614_p8 = por %p117_p2, %p61_p9 }
  0x2c   : > { %s2055_s25 = scalar_select %p1602_p3, 1, 0 }
  0x2d   : > { %s2056_s26 = scalar_select %p1610_p6, 1, 0 }
  0x2e   : > { %s2057_s27 = scalar_select %p1614_p8, 1, 0 }
  0x2f   : > { %p124_p10 = scmp.lt.s32.totalorder %s1483_s15, 5  ;;  %s976_s28 = sshll.u32 %s150_s21, 1 }
  0x30   : > { %s1488_s5 = smov [#allocation2]   ;;  %s992_s7 = sshll.u32 %s1483_s15, 5 }
  0x31   : > { %p1621_p11 = pnand %p969_p4, %p124_p10  ;;  %s137_s6 = sshll.u32 %s1488_s5, 4  ;;  %s1625_s6 = int_to_ptr.vmem [resolvable:$true] %s137_s6 }
  0x32   : > { %s1633_s10 = scalar_lea.hbm %s2047_s2, %s992_s7  ;;  %s174_s21 = scalar_lea.vmem [#allocation7], %s976_s28 }
  0x33   : > { %s2058_s4 = scalar_select %p1621_p11, 1, 0 }
  0x34   : > { %p1268_p0 = pneg %p1621_p11  ;;  %s182_s11 = sshll.u32 %s174_s21, 4  ;;  %s183_s11 = int_to_ptr.vmem [resolvable:$true] %s182_s11 }
  0x35   : > { %s1355_s18 = scalar_lea.hbm %s1633_s10, 32  ;;  %s1360_s24 = scalar_lea.hbm %s2047_s2, 128 }
  0x36   : > { %p1637_p12 = pnand %p1268_p0, %p2049_p13  ;;  %p1356_p9 = scmp.ne.s32.totalorder %s1633_s10, %s1355_s18 }
  0x37   : > { %p1361_p4 = scmp.lt.u32.totalorder %s1633_s10, %s2047_s2  ;;  %p1362_p10 = scmp.lt.u32.totalorder %s1360_s24, %s1355_s18 }
  0x38   : > { %s2059_s17 = scalar_select %p1637_p12, 1, 0 }
  0x39   : > { %p1358_p1 = pnand %p1356_p9, %p1327_p7  ;;  %p1363_p0 = por %p1362_p10, %p1361_p4 }
  0x3a   : > { %p1364_p13 = scmp.lt.u32.totalorder %s1355_s18, %s1633_s10 }
  0x3b   : > { %p1359_p2 = pneg %p1358_p1 }
  0x3c   : > { %p1365_p8 = por %p1364_p13, %p1363_p0 }
  0x3e   : > { %p1366_p6 = pnand %p1365_p8, %p1359_p2 }
  0x40   : > { %1369 = shalt.err (!%p1366_p6)
}
  0x41   : > { %s1370_s28 = scalar_lea.vmem %s183_s11, 32  ;;  %s1489_s8 = smov [#allocation7]  }
  0x42   : > { %p1371_p3 = scmp.ne.s32.totalorder %s183_s11, %s1370_s28  ;;  %s1375_s9 = sshll.u32 %s1489_s8, 4  ;;  %s1376_s9 = int_to_ptr.vmem [resolvable:$false] %s1375_s9 }
  0x43   : > { %s1377_s21 = scalar_lea.vmem %s1376_s9, 64  ;;  %p1378_p11 = scmp.lt.s32.totalorder %s183_s11, %s1376_s9 }
  0x44   : > { %p1373_p9 = pnand %p1371_p3, %p1327_p7  ;;  %p1379_p12 = scmp.lt.s32.totalorder %s1377_s21, %s1370_s28 }
  0x46   : > { %p1374_p1 = pneg %p1373_p9  ;;  %p1380_p4 = por %p1379_p12, %p1378_p11 }
  0x48   : > { %p1381_p10 = pnand %p1380_p4, %p1374_p1 }
  0x4a   : > { %1384 = shalt.err (!%p1381_p10)
}
  0x4b   : > { %1278 = dma.hbm_to_vmem [thread:$0]  (!%p1558_p5), %s1633_s10, 32, %s183_s11, %s1564_s30  }
  0x4c   : > { %s1385_s22 = scalar_lea.hbm %s2045_s0, 256  ;;  %p2060_p13 = scmp.ne.s32.totalorder %s2059_s17, 0 }
  0x4d   : > { %p1386_p7 = scmp.ne.s32.totalorder %s2045_s0, %s1385_s22  ;;  %p1392_p11 = scmp.lt.u32.totalorder %s1385_s22, %s2045_s0 }
  0x4e   : > { %p1387_p3 = pneg %p2060_p13 }
  0x50   : > { %p1388_p6 = pnand %p1387_p3, %p1386_p7 }
  0x52   : > { %p1389_p8 = pneg %p1388_p6 }
  0x54   : > { %p1394_p12 = pnand %p1392_p11, %p1389_p8 }
  0x56   : > { %1397 = shalt.err (!%p1394_p12)
}
  0x57   : > { %s1398_s29 = scalar_lea.vmem %s1625_s6, 256  ;;  %p1406_p9 = scmp.lt.s32.totalorder %s1625_s6, %s1625_s6 }
  0x58   : > { %p1399_p5 = scmp.ne.s32.totalorder %s1625_s6, %s1398_s29  ;;  %p1407_p1 = scmp.lt.s32.totalorder %s1398_s29, %s1398_s29 }
  0x5a   : > { %p1401_p2 = pnand %p1399_p5, %p1387_p3  ;;  %p1408_p4 = por %p1407_p1, %p1406_p9 }
  0x5c   : > { %p1402_p0 = pneg %p1401_p2 }
  0x5e   : > { %p1409_p10 = pnand %p1408_p4, %p1402_p0 }
  0x60   : > { %1412 = shalt.err (!%p1409_p10)
}
  0x61   : > { %1271 = dma.hbm_to_vmem [thread:$0]  (!%p2060_p13), %s2045_s0, 256, %s1625_s6, [#allocation3]  }
  0x62   : > { %p2061_p7 = scmp.ne.s32.totalorder %s2058_s4, 0 }
  0x63   : > { %p2062_p6 = scmp.eq.s32.totalorder (!%p2061_p7), %s1593_s23, 0 }
  0x64   : > { %191 = sbr.rel (%p2061_p7) target bundleno = 606 (0x25e), region = 32 }
  0x6b   : > { %1458 = dma.done.wait (%p2062_p6), [#allocation3], 256   ;;  %p2063_p3 = pmov %p2062_p6 }
  0x6c   : > { %s197_s11 = sand.u32 1, %s1593_s23   ;;  %s1690_s8 = sand.u32 1, %s1475_s13  }
  0x6d   : > { %1460 = vsyncadd (%p2063_p3), [#allocation3], 4294967040  ;;  %s981_s17 = sshll.u32 %s1690_s8, 11  ;;  %s198_s9 = scalar_lea.sflag [#allocation6], %s197_s11 }
  0x6e   : > { %s1693_s21 = scalar_lea.vmem [#allocation5], %s981_s17  ;;  %p2064_p13 = scmp.ne.s32.totalorder %s2055_s25, 0 }
  0x70   : > { %1462 = dma.done.wait (%p2064_p13), %s198_s9, 32800  }
  0x71   : > { %1464 = vsyncadd (%p2064_p13), %s198_s9, 4294934496  ;;  %v244_v0 = vld [vmem:[%s1693_s21 + $0x8] sm:$0xff]  ;;  %v243_v5 = vld [vmem:[%s1693_s21] sm:$0xff]  ;;  %v501_v62 = vlaneseq  ;;  %v1490_v63 = vmov 1983009808   ;;  %s982_s25 = sshll.u32 %s1690_s8, 1 }
  0x72   : > { %v252_v1 = vld [vmem:[%s1693_s21 + $0x48] sm:$0xff]  ;;  %v251_v6 = vld [vmem:[%s1693_s21 + $0x40] sm:$0xff]  ;;  %s210_s4 = scalar_lea.vmem [#allocation7], %s982_s25  ;;  %s983_s6 = sshll.u32 %s1690_s8, 2 }
  0x73   : > { %v248_v2 = vld [vmem:[%s1693_s21 + $0x28] sm:$0xff]  ;;  %v994_v3 = vpack.c.bf16 %v252_v1, %v244_v0  ;;  %v996_v8 = vpack.c.bf16 %v251_v6, %v243_v5  ;;  %v247_v9 = vld [vmem:[%s1693_s21 + $0x20] sm:$0xff]  ;;  %v515_v0 = vunpack.c.l.s4 %v1490_v63  ;;  %v1743_v5 = vshrl.u32 %v501_v62, 7  ;;  %s993_s18 = sshll.u32 %s1593_s23, 6  ;;  %s237_s20 = scalar_lea.vmem [#allocation8], %s983_s6 }
  0x74   : > { %v256_v4 = vld [vmem:[%s1693_s21 + $0x68] sm:$0xff]  ;;  %v255_v10 = vld [vmem:[%s1693_s21 + $0x60] sm:$0xff]  ;;  %s866_s22 = sshll.u32 %s237_s20, 4  ;;  %s2002_s7 = scalar_lea.hbm %s2048_s3, %s993_s18  ;;  %s2004_s22 = int_to_ptr.vmem [resolvable:$true] %s866_s22 }
  0x75   : > { %v1122_v7 = vpack.c.bf16 %v256_v4, %v248_v2  ;;  %v260_v11 = vld [vmem:[%s1693_s21 + $0x88] sm:$0xff]  ;;  %995 = vmatprep.subr.bf16.mxu1 %v994_v3  ;;  %v1124_v12 = vpack.c.bf16 %v255_v10, %v247_v9  ;;  %v259_v18 = vld [vmem:[%s1693_s21 + $0x80] sm:$0xff]  ;;  %v516_v6 = vunpack.c.0.s8 %v515_v0  ;;  %s852_s28 = scalar_lea.sflag [#allocation4], %s1690_s8  ;;  %s1413_s29 = scalar_lea.vmem %s2004_s22, 64 }
  0x76   : > { %v268_v13 = vld [vmem:[%s1693_s21 + $0xc8] sm:$0xff]  ;;  %997 = vmatpush1.bf16.xpose.msra.mxu1 %v996_v8  ;;  %v267_v19 = vld [vmem:[%s1693_s21 + $0xc0] sm:$0xff]  ;;  %p1414_p8 = scmp.ne.s32.totalorder %s2004_s22, %s1413_s29  ;;  %p2065_p11 = scmp.ne.s32.totalorder %s2056_s26, 0 }
  0x77   : > { %v264_v14 = vld [vmem:[%s1693_s21 + $0xa8] sm:$0xff]  ;;  %1123 = vmatprep.subr.bf16.mxu0 %v1122_v7  ;;  %v998_v16 = vpack.c.bf16 %v268_v13, %v260_v11  ;;  %v263_v20 = vld [vmem:[%s1693_s21 + $0xa0] sm:$0xff]  ;;  %v1000_v26 = vpack.c.bf16 %v267_v19, %v259_v18  ;;  %s1491_s23 = smov [#allocation8]  }
  0x78   : > { %v272_v15 = vld [vmem:[%s1693_s21 + $0xe8] sm:$0xff]  ;;  %1125 = vmatpush1.bf16.xpose.msra.mxu0 %v1124_v12  ;;  %v271_v21 = vld [vmem:[%s1693_s21 + $0xe0] sm:$0xff]  ;;  %p1415_p12 = pnand %p1414_p8, %p2065_p11  ;;  %s1417_s30 = sshll.u32 %s1491_s23, 4  ;;  %s1418_s30 = int_to_ptr.vmem [resolvable:$false] %s1417_s30 }
  0x79   : > { %v1126_v17 = vpack.c.bf16 %v272_v15, %v264_v14  ;;  %999 = vmatprep.subr.bf16.mxu1 %v998_v16  ;;  %v276_v22 = vld [vmem:[%s1693_s21 + $0x108] sm:$0xff]  ;;  %v1128_v27 = vpack.c.bf16 %v271_v21, %v263_v20  ;;  %v275_v30 = vld [vmem:[%s1693_s21 + $0x100] sm:$0xff]  ;;  %v1754_v15 = vsub.s32 %v516_v6, %v1743_v5  ;;  %v1756_v20 = vld [vmem:[#allocation2] sm:$0xff]  ;;  %s1419_s10 = scalar_lea.vmem %s1418_s30, 128  ;;  %p1420_p2 = scmp.lt.s32.totalorder %s2004_s22, %s1418_s30 }
  0x7a   : > { %v284_v23 = vld [vmem:[%s1693_s21 + $0x148] sm:$0xff]  ;;  %v283_v31 = vld [vmem:[%s1693_s21 + $0x140] sm:$0xff]  ;;  %p1416_p5 = pneg %p1415_p12  ;;  %p1421_p0 = scmp.lt.s32.totalorder %s1419_s10, %s1413_s29 }
  0x7b   : > { %1127 = vmatprep.subr.bf16.mxu0 %v1126_v17  ;;  %v280_v24 = vld [vmem:[%s1693_s21 + $0x128] sm:$0xff]  ;;  %v1002_v28 = vpack.c.bf16 %v284_v23, %v276_v22  ;;  %v279_v32 = vld [vmem:[%s1693_s21 + $0x120] sm:$0xff]  ;;  %v1004_v38 = vpack.c.bf16 %v283_v31, %v275_v30  ;;  %v1760_v21 = vrot.slane %v1756_v20, %v1754_v15  ;;  %v1762_v22 = vld [vmem:[#allocation2 + $0x8] sm:$0xff] }
  0x7c   : > { %v288_v25 = vld [vmem:[%s1693_s21 + $0x168] sm:$0xff]  ;;  %v287_v33 = vld [vmem:[%s1693_s21 + $0x160] sm:$0xff]  ;;  %v1766_v23 = vrot.slane %v1762_v22, %v1754_v15  ;;  %p1422_p9 = por %p1421_p0, %p1420_p2 }
  0x7d   : > { %v1130_v29 = vpack.c.bf16 %v288_v25, %v280_v24  ;;  %v292_v34 = vld [vmem:[%s1693_s21 + $0x188] sm:$0xff]  ;;  %v1132_v39 = vpack.c.bf16 %v287_v33, %v279_v32  ;;  %v291_v42 = vld [vmem:[%s1693_s21 + $0x180] sm:$0xff] }
  0x7e   : > { %1001 = vmatpush1.bf16.xpose.msra.mxu1 %v1000_v26  ;;  %v300_v35 = vld [vmem:[%s1693_s21 + $0x1c8] sm:$0xff]  ;;  %v299_v43 = vld [vmem:[%s1693_s21 + $0x1c0] sm:$0xff]  ;;  %v545_v31 = vcombine.high %v1766_v23, %v1766_v23  ;;  %p1423_p1 = pnand %p1422_p9, %p1416_p5 }
  0x7f   : > { %1003 = vmatprep.subr.bf16.mxu1 %v1002_v28  ;;  %v296_v36 = vld [vmem:[%s1693_s21 + $0x1a8] sm:$0xff]  ;;  %v1006_v40 = vpack.c.bf16 %v300_v35, %v292_v34  ;;  %v295_v44 = vld [vmem:[%s1693_s21 + $0x1a0] sm:$0xff]  ;;  %v1008_v50 = vpack.c.bf16 %v299_v43, %v291_v42 }
  0x80   : > { %1129 = vmatpush1.bf16.xpose.msra.mxu0 %v1128_v27  ;;  %v304_v37 = vld [vmem:[%s1693_s21 + $0x1e8] sm:$0xff]  ;;  %v303_v45 = vld [vmem:[%s1693_s21 + $0x1e0] sm:$0xff]  ;;  %v528_v27 = vcombine.high %v1760_v21, %v1760_v21  ;;  %761 = vmatprep.mubr.f32.mxu0 %v545_v31 }
  0x81   : > { %1131 = vmatprep.subr.bf16.mxu0 %v1130_v29  ;;  %v1134_v41 = vpack.c.bf16 %v304_v37, %v296_v36  ;;  %v308_v46 = vld [vmem:[%s1693_s21 + $0x208] sm:$0xff]  ;;  %v1136_v51 = vpack.c.bf16 %v303_v45, %v295_v44  ;;  %v307_v54 = vld [vmem:[%s1693_s21 + $0x200] sm:$0xff] }
  0x82   : > { %v316_v47 = vld [vmem:[%s1693_s21 + $0x248] sm:$0xff]  ;;  %v315_v55 = vld [vmem:[%s1693_s21 + $0x240] sm:$0xff]  ;;  %619 = vmatprep.mubr.f32.mxu1 %v528_v27 }
  0x83   : > { %v312_v48 = vld [vmem:[%s1693_s21 + $0x228] sm:$0xff]  ;;  %v1010_v52 = vpack.c.bf16 %v316_v47, %v308_v46  ;;  %v311_v56 = vld [vmem:[%s1693_s21 + $0x220] sm:$0xff]  ;;  %v1012_v1 = vpack.c.bf16 %v315_v55, %v307_v54 }
  0x84   : > { %v320_v49 = vld [vmem:[%s1693_s21 + $0x268] sm:$0xff]  ;;  %v319_v57 = vld [vmem:[%s1693_s21 + $0x260] sm:$0xff] }
  0x85   : > { %v1138_v53 = vpack.c.bf16 %v320_v49, %v312_v48  ;;  %v324_v58 = vld [vmem:[%s1693_s21 + $0x288] sm:$0xff]  ;;  %v1140_v2 = vpack.c.bf16 %v319_v57, %v311_v56  ;;  %v323_v7 = vld [vmem:[%s1693_s21 + $0x280] sm:$0xff] }
  0x86   : > { %1005 = vmatpush1.bf16.xpose.msra.mxu1 %v1004_v38  ;;  %v332_v59 = vld [vmem:[%s1693_s21 + $0x2c8] sm:$0xff]  ;;  %v331_v8 = vld [vmem:[%s1693_s21 + $0x2c0] sm:$0xff] }
  0x87   : > { %1007 = vmatprep.subr.bf16.mxu1 %v1006_v40  ;;  %v328_v60 = vld [vmem:[%s1693_s21 + $0x2a8] sm:$0xff]  ;;  %v1014_v3 = vpack.c.bf16 %v332_v59, %v324_v58  ;;  %v327_v9 = vld [vmem:[%s1693_s21 + $0x2a0] sm:$0xff]  ;;  %v1016_v16 = vpack.c.bf16 %v331_v8, %v323_v7 }
  0x88   : > { %1133 = vmatpush1.bf16.xpose.msra.mxu0 %v1132_v39  ;;  %v336_v61 = vld [vmem:[%s1693_s21 + $0x2e8] sm:$0xff]  ;;  %v335_v10 = vld [vmem:[%s1693_s21 + $0x2e0] sm:$0xff] }
  0x89   : > { %1135 = vmatprep.subr.bf16.mxu0 %v1134_v41  ;;  %v1142_v4 = vpack.c.bf16 %v336_v61, %v328_v60  ;;  %v340_v11 = vld [vmem:[%s1693_s21 + $0x308] sm:$0xff]  ;;  %v1144_v17 = vpack.c.bf16 %v335_v10, %v327_v9  ;;  %v339_v24 = vld [vmem:[%s1693_s21 + $0x300] sm:$0xff] }
  0x8a   : > { %v348_v12 = vld [vmem:[%s1693_s21 + $0x348] sm:$0xff]  ;;  %v347_v25 = vld [vmem:[%s1693_s21 + $0x340] sm:$0xff] }
  0x8b   : > { %v344_v13 = vld [vmem:[%s1693_s21 + $0x328] sm:$0xff]  ;;  %v1018_v18 = vpack.c.bf16 %v348_v12, %v340_v11  ;;  %v343_v26 = vld [vmem:[%s1693_s21 + $0x320] sm:$0xff]  ;;  %v1020_v34 = vpack.c.bf16 %v347_v25, %v339_v24 }
  0x8c   : > { %v352_v14 = vld [vmem:[%s1693_s21 + $0x368] sm:$0xff]  ;;  %v351_v28 = vld [vmem:[%s1693_s21 + $0x360] sm:$0xff] }
  0x8d   : > { %v1146_v19 = vpack.c.bf16 %v352_v14, %v344_v13  ;;  %v356_v29 = vld [vmem:[%s1693_s21 + $0x388] sm:$0xff]  ;;  %v1148_v35 = vpack.c.bf16 %v351_v28, %v343_v26  ;;  %v355_v38 = vld [vmem:[%s1693_s21 + $0x380] sm:$0xff] }
  0x8e   : > { %1009 = vmatpush1.bf16.xpose.msra.mxu1 %v1008_v50  ;;  %v364_v30 = vld [vmem:[%s1693_s21 + $0x3c8] sm:$0xff]  ;;  %v363_v39 = vld [vmem:[%s1693_s21 + $0x3c0] sm:$0xff] }
  0x8f   : > { %1011 = vmatprep.subr.bf16.mxu1 %v1010_v52  ;;  %v360_v32 = vld [vmem:[%s1693_s21 + $0x3a8] sm:$0xff]  ;;  %v1022_v36 = vpack.c.bf16 %v364_v30, %v356_v29  ;;  %v359_v40 = vld [vmem:[%s1693_s21 + $0x3a0] sm:$0xff]  ;;  %v1024_v46 = vpack.c.bf16 %v363_v39, %v355_v38 }
  0x90   : > { %1137 = vmatpush1.bf16.xpose.msra.mxu0 %v1136_v51  ;;  %v368_v33 = vld [vmem:[%s1693_s21 + $0x3e8] sm:$0xff]  ;;  %v367_v41 = vld [vmem:[%s1693_s21 + $0x3e0] sm:$0xff] }
  0x91   : > { %1139 = vmatprep.subr.bf16.mxu0 %v1138_v53  ;;  %v1150_v37 = vpack.c.bf16 %v368_v33, %v360_v32  ;;  %v372_v42 = vld [vmem:[%s1693_s21 + $0x408] sm:$0xff]  ;;  %v1152_v47 = vpack.c.bf16 %v367_v41, %v359_v40  ;;  %v371_v50 = vld [vmem:[%s1693_s21 + $0x400] sm:$0xff] }
  0x92   : > { %v380_v43 = vld [vmem:[%s1693_s21 + $0x448] sm:$0xff]  ;;  %v379_v51 = vld [vmem:[%s1693_s21 + $0x440] sm:$0xff] }
  0x93   : > { %v376_v44 = vld [vmem:[%s1693_s21 + $0x428] sm:$0xff]  ;;  %v1026_v48 = vpack.c.bf16 %v380_v43, %v372_v42  ;;  %v375_v52 = vld [vmem:[%s1693_s21 + $0x420] sm:$0xff]  ;;  %v1028_v58 = vpack.c.bf16 %v379_v51, %v371_v50 }
  0x94   : > { %v384_v45 = vld [vmem:[%s1693_s21 + $0x468] sm:$0xff]  ;;  %v383_v53 = vld [vmem:[%s1693_s21 + $0x460] sm:$0xff] }
  0x95   : > { %v1154_v49 = vpack.c.bf16 %v384_v45, %v376_v44  ;;  %v388_v54 = vld [vmem:[%s1693_s21 + $0x488] sm:$0xff]  ;;  %v1156_v59 = vpack.c.bf16 %v383_v53, %v375_v52  ;;  %v387_v62 = vld [vmem:[%s1693_s21 + $0x480] sm:$0xff] }
  0x96   : > { %1013 = vmatpush1.bf16.xpose.msra.mxu1 %v1012_v1  ;;  %v396_v55 = vld [vmem:[%s1693_s21 + $0x4c8] sm:$0xff]  ;;  %v395_v63 = vld [vmem:[%s1693_s21 + $0x4c0] sm:$0xff] }
  0x97   : > { %1015 = vmatprep.subr.bf16.mxu1 %v1014_v3  ;;  %v392_v56 = vld [vmem:[%s1693_s21 + $0x4a8] sm:$0xff]  ;;  %v1030_v60 = vpack.c.bf16 %v396_v55, %v388_v54  ;;  %v391_v0 = vld [vmem:[%s1693_s21 + $0x4a0] sm:$0xff]  ;;  %v1032_v7 = vpack.c.bf16 %v395_v63, %v387_v62 }
  0x98   : > { %1141 = vmatpush1.bf16.xpose.msra.mxu0 %v1140_v2  ;;  %v400_v57 = vld [vmem:[%s1693_s21 + $0x4e8] sm:$0xff]  ;;  %v399_v1 = vld [vmem:[%s1693_s21 + $0x4e0] sm:$0xff] }
  0x99   : > { %1143 = vmatprep.subr.bf16.mxu0 %v1142_v4  ;;  %v1158_v61 = vpack.c.bf16 %v400_v57, %v392_v56  ;;  %v404_v2 = vld [vmem:[%s1693_s21 + $0x508] sm:$0xff]  ;;  %v1160_v8 = vpack.c.bf16 %v399_v1, %v391_v0  ;;  %v403_v11 = vld [vmem:[%s1693_s21 + $0x500] sm:$0xff] }
  0x9a   : > { %v412_v3 = vld [vmem:[%s1693_s21 + $0x548] sm:$0xff]  ;;  %v411_v12 = vld [vmem:[%s1693_s21 + $0x540] sm:$0xff] }
  0x9b   : > { %v408_v4 = vld [vmem:[%s1693_s21 + $0x528] sm:$0xff]  ;;  %v1034_v9 = vpack.c.bf16 %v412_v3, %v404_v2  ;;  %v407_v13 = vld [vmem:[%s1693_s21 + $0x520] sm:$0xff]  ;;  %v1036_v24 = vpack.c.bf16 %v411_v12, %v403_v11 }
  0x9c   : > { %v416_v6 = vld [vmem:[%s1693_s21 + $0x568] sm:$0xff]  ;;  %v415_v14 = vld [vmem:[%s1693_s21 + $0x560] sm:$0xff] }
  0x9d   : > { %v1162_v10 = vpack.c.bf16 %v416_v6, %v408_v4  ;;  %v1164_v25 = vpack.c.bf16 %v415_v14, %v407_v13  ;;  %v419_v28 = vld [vmem:[%s1693_s21 + $0x580] sm:$0xff]  ;;  %v436_v32 = vld [vmem:[%s1693_s21 + $0x608] sm:$0xff] }
  0x9e   : > { %1017 = vmatpush1.bf16.xpose.msra.mxu1 %v1016_v16  ;;  %v420_v16 = vld [vmem:[%s1693_s21 + $0x588] sm:$0xff]  ;;  %v427_v29 = vld [vmem:[%s1693_s21 + $0x5c0] sm:$0xff] }
  0x9f   : > { %1019 = vmatprep.subr.bf16.mxu1 %v1018_v18  ;;  %v424_v18 = vld [vmem:[%s1693_s21 + $0x5a8] sm:$0xff]  ;;  %v423_v30 = vld [vmem:[%s1693_s21 + $0x5a0] sm:$0xff] }
  0xa0   : > { %1145 = vmatpush1.bf16.xpose.msra.mxu0 %v1144_v17  ;;  %v428_v17 = vld [vmem:[%s1693_s21 + $0x5c8] sm:$0xff]  ;;  %v431_v31 = vld [vmem:[%s1693_s21 + $0x5e0] sm:$0xff] }
  0xa1   : > { %1147 = vmatprep.subr.bf16.mxu0 %v1146_v19  ;;  %v432_v19 = vld [vmem:[%s1693_s21 + $0x5e8] sm:$0xff]  ;;  %v1038_v26 = vpack.c.bf16 %v428_v17, %v420_v16  ;;  %v435_v40 = vld [vmem:[%s1693_s21 + $0x600] sm:$0xff] }
  0xa2   : > { %v1166_v27 = vpack.c.bf16 %v432_v19, %v424_v18  ;;  %v444_v33 = vld [vmem:[%s1693_s21 + $0x648] sm:$0xff]  ;;  %v443_v41 = vld [vmem:[%s1693_s21 + $0x640] sm:$0xff]  ;;  %v246_v18 = vld [vmem:[%s1693_s21 + $0x18] sm:$0xff] }
  0xa3   : > { %v1042_v38 = vpack.c.bf16 %v444_v33, %v436_v32  ;;  %v439_v42 = vld [vmem:[%s1693_s21 + $0x620] sm:$0xff]  ;;  %v452_v44 = vld [vmem:[%s1693_s21 + $0x688] sm:$0xff]  ;;  %v254_v19 = vld [vmem:[%s1693_s21 + $0x58] sm:$0xff] }
  0xa4   : > { %v447_v43 = vld [vmem:[%s1693_s21 + $0x660] sm:$0xff]  ;;  %v460_v45 = vld [vmem:[%s1693_s21 + $0x6c8] sm:$0xff]  ;;  %v245_v32 = vld [vmem:[%s1693_s21 + $0x10] sm:$0xff] }
  0xa5   : > { %v1046_v50 = vpack.c.bf16 %v460_v45, %v452_v44  ;;  %v451_v52 = vld [vmem:[%s1693_s21 + $0x680] sm:$0xff]  ;;  %v468_v56 = vld [vmem:[%s1693_s21 + $0x708] sm:$0xff]  ;;  %v253_v33 = vld [vmem:[%s1693_s21 + $0x50] sm:$0xff] }
  0xa6   : > { %1021 = vmatpush1.bf16.xpose.msra.mxu1 %v1020_v34  ;;  %v440_v34 = vld [vmem:[%s1693_s21 + $0x628] sm:$0xff]  ;;  %v459_v53 = vld [vmem:[%s1693_s21 + $0x6c0] sm:$0xff] }
  0xa7   : > { %1023 = vmatprep.subr.bf16.mxu1 %v1022_v36  ;;  %v1040_v36 = vpack.c.bf16 %v427_v29, %v419_v28  ;;  %v455_v54 = vld [vmem:[%s1693_s21 + $0x6a0] sm:$0xff]  ;;  %v476_v57 = vld [vmem:[%s1693_s21 + $0x748] sm:$0xff]  ;;  %v1058_v28 = vpack.c.bf16 %v254_v19, %v246_v18  ;;  %v513_v29 = vcombine.high %v1756_v20, %v1756_v20  ;;  %v266_v20 = vld [vmem:[%s1693_s21 + $0xb8] sm:$0xff] }
  0xa8   : > { %1149 = vmatpush1.bf16.xpose.msra.mxu0 %v1148_v35  ;;  %v448_v35 = vld [vmem:[%s1693_s21 + $0x668] sm:$0xff]  ;;  %v463_v55 = vld [vmem:[%s1693_s21 + $0x6e0] sm:$0xff]  ;;  %v1050_v62 = vpack.c.bf16 %v476_v57, %v468_v56  ;;  %v285_v56 = vld [vmem:[%s1693_s21 + $0x150] sm:$0xff] }
  0xa9   : > { %1151 = vmatprep.subr.bf16.mxu0 %v1150_v37  ;;  %v1168_v37 = vpack.c.bf16 %v431_v31, %v423_v30  ;;  %v1170_v39 = vpack.c.bf16 %v448_v35, %v440_v34  ;;  %v467_v0 = vld [vmem:[%s1693_s21 + $0x700] sm:$0xff]  ;;  %v484_v4 = vld [vmem:[%s1693_s21 + $0x788] sm:$0xff]  ;;  %v530_v31 = vcombine.high %v1762_v22, %v1762_v22  ;;  %v249_v34 = vld [vmem:[%s1693_s21 + $0x30] sm:$0xff] }
  0xaa   : > { %v475_v1 = vld [vmem:[%s1693_s21 + $0x740] sm:$0xff]  ;;  %v492_v6 = vld [vmem:[%s1693_s21 + $0x7c8] sm:$0xff]  ;;  %v257_v35 = vld [vmem:[%s1693_s21 + $0x70] sm:$0xff] }
  0xab   : > { %v471_v2 = vld [vmem:[%s1693_s21 + $0x720] sm:$0xff]  ;;  %v1054_v11 = vpack.c.bf16 %v492_v6, %v484_v4  ;;  %v1868_v22 = vrot.slane %v530_v31, %v1754_v15  ;;  %v281_v57 = vld [vmem:[%s1693_s21 + $0x130] sm:$0xff] }
  0xac   : > { %v479_v3 = vld [vmem:[%s1693_s21 + $0x760] sm:$0xff]  ;;  %v301_v4 = vld [vmem:[%s1693_s21 + $0x1d0] sm:$0xff] }
  0xad   : > { %v483_v13 = vld [vmem:[%s1693_s21 + $0x780] sm:$0xff]  ;;  %v546_v45 = vcombine.high %v1868_v22, %v1868_v22  ;;  %v297_v6 = vld [vmem:[%s1693_s21 + $0x1b0] sm:$0xff] }
  0xae   : > { %1025 = vmatpush1.bf16.xpose.msra.mxu1 %v1024_v46  ;;  %v456_v46 = vld [vmem:[%s1693_s21 + $0x6a8] sm:$0xff]  ;;  %v491_v14 = vld [vmem:[%s1693_s21 + $0x7c0] sm:$0xff]  ;;  %v317_v18 = vld [vmem:[%s1693_s21 + $0x250] sm:$0xff] }
  0xaf   : > { %1027 = vmatprep.subr.bf16.mxu1 %v1026_v48  ;;  %v1044_v48 = vpack.c.bf16 %v443_v41, %v435_v40  ;;  %v487_v16 = vld [vmem:[%s1693_s21 + $0x7a0] sm:$0xff]  ;;  %v1060_v40 = vpack.c.bf16 %v253_v33, %v245_v32  ;;  %v1188_v41 = vpack.c.bf16 %v257_v35, %v249_v34  ;;  %v313_v19 = vld [vmem:[%s1693_s21 + $0x230] sm:$0xff] }
  0xb0   : > { %1153 = vmatpush1.bf16.xpose.msra.mxu0 %v1152_v47  ;;  %v464_v47 = vld [vmem:[%s1693_s21 + $0x6e8] sm:$0xff]  ;;  %v495_v17 = vld [vmem:[%s1693_s21 + $0x7e0] sm:$0xff]  ;;  %v325_v33 = vld [vmem:[%s1693_s21 + $0x290] sm:$0xff] }
  0xb1   : > { %1155 = vmatprep.subr.bf16.mxu0 %v1154_v49  ;;  %v1172_v49 = vpack.c.bf16 %v447_v43, %v439_v42  ;;  %v1174_v51 = vpack.c.bf16 %v464_v47, %v456_v46  ;;  %v269_v46 = vld [vmem:[%s1693_s21 + $0xd0] sm:$0xff] }
  0xb2   : > { %v265_v47 = vld [vmem:[%s1693_s21 + $0xb0] sm:$0xff] }
  0xb3   : > { %v333_v34 = vld [vmem:[%s1693_s21 + $0x2d0] sm:$0xff] }
  0xb4   : > { %v329_v35 = vld [vmem:[%s1693_s21 + $0x2b0] sm:$0xff] }
  0xb6   : > { %1029 = vmatpush1.bf16.xpose.msra.mxu1 %v1028_v58  ;;  %v472_v58 = vld [vmem:[%s1693_s21 + $0x728] sm:$0xff] }
  0xb7   : > { %1031 = vmatprep.subr.bf16.mxu1 %v1030_v60  ;;  %v1048_v60 = vpack.c.bf16 %v459_v53, %v451_v52 }
  0xb8   : > { %1157 = vmatpush1.bf16.xpose.msra.mxu0 %v1156_v59  ;;  %v480_v59 = vld [vmem:[%s1693_s21 + $0x768] sm:$0xff] }
  0xb9   : > { %1159 = vmatprep.subr.bf16.mxu0 %v1158_v61  ;;  %v1176_v61 = vpack.c.bf16 %v463_v55, %v455_v54  ;;  %v1178_v63 = vpack.c.bf16 %v480_v59, %v472_v58  ;;  %v277_v55 = vld [vmem:[%s1693_s21 + $0x110] sm:$0xff]  ;;  %v294_v59 = vld [vmem:[%s1693_s21 + $0x198] sm:$0xff] }
  0xba   : > { %v289_v58 = vld [vmem:[%s1693_s21 + $0x170] sm:$0xff] }
  0xbe   : > { %1033 = vmatpush1.bf16.xpose.msra.mxu1 %v1032_v7  ;;  %v488_v7 = vld [vmem:[%s1693_s21 + $0x7a8] sm:$0xff] }
  0xbf   : > { %1035 = vmatprep.subr.bf16.mxu1 %v1034_v9  ;;  %v1052_v9 = vpack.c.bf16 %v475_v1, %v467_v0  ;;  %v1196_v0 = vpack.c.bf16 %v289_v58, %v281_v57  ;;  %v369_v57 = vld [vmem:[%s1693_s21 + $0x3f0] sm:$0xff]  ;;  %v374_v58 = vld [vmem:[%s1693_s21 + $0x418] sm:$0xff] }
  0xc0   : > { %1161 = vmatpush1.bf16.xpose.msra.mxu0 %v1160_v8  ;;  %v496_v8 = vld [vmem:[%s1693_s21 + $0x7e8] sm:$0xff] }
  0xc1   : > { %1163 = vmatprep.subr.bf16.mxu0 %v1162_v10  ;;  %v1180_v10 = vpack.c.bf16 %v479_v3, %v471_v2  ;;  %v1182_v12 = vpack.c.bf16 %v496_v8, %v488_v7  ;;  %v293_v3 = vld [vmem:[%s1693_s21 + $0x190] sm:$0xff]  ;;  %v310_v8 = vld [vmem:[%s1693_s21 + $0x218] sm:$0xff] }
  0xc2   : > { %v305_v7 = vld [vmem:[%s1693_s21 + $0x1f0] sm:$0xff] }
  0xc6   : > { %1037 = vmatpush1.bf16.xpose.msra.mxu1 %v1036_v24  ;;  %v250_v24 = vld [vmem:[%s1693_s21 + $0x38] sm:$0xff] }
  0xc7   : > { %1039 = vmatprep.subr.bf16.mxu1 %v1038_v26  ;;  %v1056_v26 = vpack.c.bf16 %v491_v14, %v483_v13  ;;  %v1200_v13 = vpack.c.bf16 %v305_v7, %v297_v6  ;;  %v385_v6 = vld [vmem:[%s1693_s21 + $0x470] sm:$0xff]  ;;  %v390_v7 = vld [vmem:[%s1693_s21 + $0x498] sm:$0xff] }
  0xc8   : > { %1165 = vmatpush1.bf16.xpose.msra.mxu0 %v1164_v25  ;;  %v258_v25 = vld [vmem:[%s1693_s21 + $0x78] sm:$0xff] }
  0xc9   : > { %1167 = vmatprep.subr.bf16.mxu0 %v1166_v27  ;;  %v1184_v27 = vpack.c.bf16 %v495_v17, %v487_v16  ;;  %v1186_v30 = vpack.c.bf16 %v258_v25, %v250_v24  ;;  %v309_v17 = vld [vmem:[%s1693_s21 + $0x210] sm:$0xff]  ;;  %v326_v25 = vld [vmem:[%s1693_s21 + $0x298] sm:$0xff] }
  0xca   : > { %v321_v24 = vld [vmem:[%s1693_s21 + $0x270] sm:$0xff] }
  0xce   : > { %1041 = vmatpush1.bf16.xpose.msra.mxu1 %v1040_v36  ;;  %v262_v36 = vld [vmem:[%s1693_s21 + $0x98] sm:$0xff] }
  0xcf   : > { %1043 = vmatprep.subr.bf16.mxu1 %v1042_v38  ;;  %v1863_v38 = vrot.slane %v513_v29, %v1754_v15  ;;  %v261_v15 = vld [vmem:[%s1693_s21 + $0x90] sm:$0xff]  ;;  %v1076_v29 = vpack.c.bf16 %v317_v18, %v309_v17 }
  0xd0   : > { %1169 = vmatpush1.bf16.xpose.msra.mxu0 %v1168_v37  ;;  %v270_v37 = vld [vmem:[%s1693_s21 + $0xd8] sm:$0xff]  ;;  %v397_v17 = vld [vmem:[%s1693_s21 + $0x4d0] sm:$0xff] }
  0xd1   : > { %1171 = vmatprep.subr.bf16.mxu0 %v1170_v39  ;;  %v274_v39 = vld [vmem:[%s1693_s21 + $0xf8] sm:$0xff]  ;;  %v1062_v42 = vpack.c.bf16 %v270_v37, %v262_v36  ;;  %v529_v44 = vcombine.high %v1863_v38, %v1863_v38  ;;  %v337_v36 = vld [vmem:[%s1693_s21 + $0x2f0] sm:$0xff] }
  0xd2   : > { %v1190_v43 = vpack.c.bf16 %v274_v39, %v266_v20  ;;  %v342_v37 = vld [vmem:[%s1693_s21 + $0x318] sm:$0xff]  ;;  %v393_v18 = vld [vmem:[%s1693_s21 + $0x4b0] sm:$0xff] }
  0xd3   : > { %v350_v20 = vld [vmem:[%s1693_s21 + $0x358] sm:$0xff] }
  0xd4   : > { %v346_v39 = vld [vmem:[%s1693_s21 + $0x338] sm:$0xff] }
  0xd6   : > { %1045 = vmatpush1.bf16.xpose.msra.mxu1 %v1044_v48  ;;  %v273_v48 = vld [vmem:[%s1693_s21 + $0xf0] sm:$0xff] }
  0xd7   : > { %1047 = vmatprep.subr.bf16.mxu1 %v1046_v50  ;;  %v286_v50 = vld [vmem:[%s1693_s21 + $0x158] sm:$0xff]  ;;  %v1192_v52 = vpack.c.bf16 %v273_v48, %v265_v47  ;;  %v353_v47 = vld [vmem:[%s1693_s21 + $0x370] sm:$0xff] }
  0xd8   : > { %1173 = vmatpush1.bf16.xpose.msra.mxu0 %v1172_v49  ;;  %v278_v49 = vld [vmem:[%s1693_s21 + $0x118] sm:$0xff] }
  0xd9   : > { %1175 = vmatprep.subr.bf16.mxu0 %v1174_v51  ;;  %v290_v51 = vld [vmem:[%s1693_s21 + $0x178] sm:$0xff]  ;;  %v1066_v53 = vpack.c.bf16 %v286_v50, %v278_v49 }
  0xda   : > { %v358_v48 = vld [vmem:[%s1693_s21 + $0x398] sm:$0xff] }
  0xdb   : > { %v366_v49 = vld [vmem:[%s1693_s21 + $0x3d8] sm:$0xff] }
  0xdc   : > { %v362_v50 = vld [vmem:[%s1693_s21 + $0x3b8] sm:$0xff] }
  0xde   : > { %1049 = vmatpush1.bf16.xpose.msra.mxu1 %v1048_v60  ;;  %v302_v60 = vld [vmem:[%s1693_s21 + $0x1d8] sm:$0xff] }
  0xdf   : > { %1051 = vmatprep.subr.bf16.mxu1 %v1050_v62  ;;  %v306_v62 = vld [vmem:[%s1693_s21 + $0x1f8] sm:$0xff]  ;;  %v1070_v1 = vpack.c.bf16 %v302_v60, %v294_v59 }
  0xe0   : > { %1177 = vmatpush1.bf16.xpose.msra.mxu0 %v1176_v61  ;;  %v298_v61 = vld [vmem:[%s1693_s21 + $0x1b8] sm:$0xff] }
  0xe1   : > { %1179 = vmatprep.subr.bf16.mxu0 %v1178_v63  ;;  %v1068_v63 = vpack.c.bf16 %v285_v56, %v277_v55  ;;  %v1198_v2 = vpack.c.bf16 %v306_v62, %v298_v61  ;;  %v365_v55 = vld [vmem:[%s1693_s21 + $0x3d0] sm:$0xff]  ;;  %v382_v59 = vld [vmem:[%s1693_s21 + $0x458] sm:$0xff] }
  0xe2   : > { %v361_v56 = vld [vmem:[%s1693_s21 + $0x3b0] sm:$0xff]  ;;  %v378_v60 = vld [vmem:[%s1693_s21 + $0x438] sm:$0xff] }
  0xe3   : > { %v386_v61 = vld [vmem:[%s1693_s21 + $0x478] sm:$0xff] }
  0xe6   : > { %1053 = vmatpush1.bf16.xpose.msra.mxu1 %v1052_v9  ;;  %v318_v9 = vld [vmem:[%s1693_s21 + $0x258] sm:$0xff] }
  0xe7   : > { %1055 = vmatprep.subr.bf16.mxu1 %v1054_v11  ;;  %v322_v11 = vld [vmem:[%s1693_s21 + $0x278] sm:$0xff]  ;;  %v1074_v14 = vpack.c.bf16 %v318_v9, %v310_v8 }
  0xe8   : > { %1181 = vmatpush1.bf16.xpose.msra.mxu0 %v1180_v10  ;;  %v314_v10 = vld [vmem:[%s1693_s21 + $0x238] sm:$0xff] }
  0xe9   : > { %1183 = vmatprep.subr.bf16.mxu0 %v1182_v12  ;;  %v1072_v12 = vpack.c.bf16 %v301_v4, %v293_v3  ;;  %v1202_v16 = vpack.c.bf16 %v322_v11, %v314_v10  ;;  %v381_v3 = vld [vmem:[%s1693_s21 + $0x450] sm:$0xff]  ;;  %v398_v8 = vld [vmem:[%s1693_s21 + $0x4d8] sm:$0xff] }
  0xea   : > { %v377_v4 = vld [vmem:[%s1693_s21 + $0x430] sm:$0xff]  ;;  %v394_v9 = vld [vmem:[%s1693_s21 + $0x4b8] sm:$0xff] }
  0xeb   : > { %v402_v10 = vld [vmem:[%s1693_s21 + $0x4f8] sm:$0xff] }
  0xee   : > { %1057 = vmatpush1.bf16.xpose.msra.mxu1 %v1056_v26  ;;  %v334_v26 = vld [vmem:[%s1693_s21 + $0x2d8] sm:$0xff] }
  0xef   : > { %1059 = vmatprep.subr.bf16.mxu1 %v1058_v28  ;;  %v338_v28 = vld [vmem:[%s1693_s21 + $0x2f8] sm:$0xff]  ;;  %v1078_v31 = vpack.c.bf16 %v334_v26, %v326_v25 }
  0xf0   : > { %1185 = vmatpush1.bf16.xpose.msra.mxu0 %v1184_v27  ;;  %v330_v27 = vld [vmem:[%s1693_s21 + $0x2b8] sm:$0xff] }
  0xf1   : > { %1187 = vmatprep.subr.bf16.mxu0 %v1186_v30  ;;  %v1204_v30 = vpack.c.bf16 %v321_v24, %v313_v19  ;;  %v1206_v32 = vpack.c.bf16 %v338_v28, %v330_v27  ;;  %v401_v19 = vld [vmem:[%s1693_s21 + $0x4f0] sm:$0xff]  ;;  %v406_v24 = vld [vmem:[%s1693_s21 + $0x518] sm:$0xff] }
  0xf2   : > { %v414_v25 = vld [vmem:[%s1693_s21 + $0x558] sm:$0xff] }
  0xf3   : > { %v410_v26 = vld [vmem:[%s1693_s21 + $0x538] sm:$0xff] }
  0xf4   : > { %v418_v27 = vld [vmem:[%s1693_s21 + $0x578] sm:$0xff] }
  0xf5   : > { %620 = vmatmul.mubr.f32.vlgmr.msra.gmra.mrb[0].mxu1 %v1760_v21  ;;  %v282_v21 = vld [vmem:[%s1693_s21 + $0x138] sm:$0xff] }
  0xf6   : > { %1061 = vmatpush1.bf16.xpose.msra.mxu1 %v1060_v40  ;;  %690 = vmatprep.mubr.f32.mxu1 %v529_v44  ;;  %v1194_v54 = vpack.c.bf16 %v290_v51, %v282_v21  ;;  %v354_v40 = vld [vmem:[%s1693_s21 + $0x378] sm:$0xff] }
  0xf7   : > { %762 = vmatmul.mubr.f32.vlgmr.msra.gmra.mrb[0].mxu0 %v1766_v23  ;;  %1063 = vmatprep.subr.bf16.mxu1 %v1062_v42  ;;  %v1064_v23 = vpack.c.bf16 %v269_v46, %v261_v15  ;;  %v1208_v42 = vpack.c.bf16 %v337_v36, %v329_v35  ;;  %v1210_v44 = vpack.c.bf16 %v354_v40, %v346_v39  ;;  %v349_v15 = vld [vmem:[%s1693_s21 + $0x350] sm:$0xff]  ;;  %v370_v21 = vld [vmem:[%s1693_s21 + $0x3f8] sm:$0xff] }
  0xf8   : > { %1189 = vmatpush1.bf16.xpose.msra.mxu0 %v1188_v41  ;;  %832 = vmatprep.mubr.f32.mxu0 %v546_v45  ;;  %v1080_v41 = vpack.c.bf16 %v333_v34, %v325_v33  ;;  %v341_v45 = vld [vmem:[%s1693_s21 + $0x310] sm:$0xff]  ;;  %v422_v36 = vld [vmem:[%s1693_s21 + $0x598] sm:$0xff] }
  0xf9   : > { %1191 = vmatprep.subr.bf16.mxu0 %v1190_v43  ;;  %v1082_v43 = vpack.c.bf16 %v350_v20, %v342_v37  ;;  %v345_v46 = vld [vmem:[%s1693_s21 + $0x330] sm:$0xff]  ;;  %v1084_v51 = vpack.c.bf16 %v349_v15, %v341_v45  ;;  %v430_v37 = vld [vmem:[%s1693_s21 + $0x5d8] sm:$0xff] }
  0xfa   : > { %v413_v33 = vld [vmem:[%s1693_s21 + $0x550] sm:$0xff]  ;;  %v426_v20 = vld [vmem:[%s1693_s21 + $0x5b8] sm:$0xff] }
  0xfb   : > { %v409_v34 = vld [vmem:[%s1693_s21 + $0x530] sm:$0xff]  ;;  %v434_v39 = vld [vmem:[%s1693_s21 + $0x5f8] sm:$0xff] }
  0xfc   : > { %v417_v35 = vld [vmem:[%s1693_s21 + $0x570] sm:$0xff] }
  0xfd   : > { %v429_v45 = vld [vmem:[%s1693_s21 + $0x5d0] sm:$0xff] }
  0xfe   : > { %1065 = vmatpush1.bf16.xpose.msra.mxu1 %v1064_v23  ;;  %v1212_v23 = vpack.c.bf16 %v353_v47, %v345_v46  ;;  %v425_v15 = vld [vmem:[%s1693_s21 + $0x5b0] sm:$0xff]  ;;  %v438_v47 = vld [vmem:[%s1693_s21 + $0x618] sm:$0xff] }
  0xff   : > { %1067 = vmatprep.subr.bf16.mxu1 %v1066_v53  ;;  %v1214_v53 = vpack.c.bf16 %v370_v21, %v362_v50  ;;  %v433_v46 = vld [vmem:[%s1693_s21 + $0x5f0] sm:$0xff]  ;;  %v450_v50 = vld [vmem:[%s1693_s21 + $0x678] sm:$0xff] }
 0x100   : > { %1193 = vmatpush1.bf16.xpose.msra.mxu0 %v1192_v52  ;;  %v1086_v52 = vpack.c.bf16 %v366_v49, %v358_v48  ;;  %v446_v48 = vld [vmem:[%s1693_s21 + $0x658] sm:$0xff] }
 0x101   : > { %1195 = vmatprep.subr.bf16.mxu0 %v1194_v54  ;;  %v357_v54 = vld [vmem:[%s1693_s21 + $0x390] sm:$0xff]  ;;  %v442_v49 = vld [vmem:[%s1693_s21 + $0x638] sm:$0xff] }
 0x102   : > { %v1088_v62 = vpack.c.bf16 %v365_v55, %v357_v54  ;;  %v445_v54 = vld [vmem:[%s1693_s21 + $0x650] sm:$0xff] }
 0x103   : > { %v441_v55 = vld [vmem:[%s1693_s21 + $0x630] sm:$0xff] }
 0x106   : > { %1069 = vmatpush1.bf16.xpose.msra.mxu1 %v1068_v63  ;;  %v1216_v63 = vpack.c.bf16 %v369_v57, %v361_v56  ;;  %v449_v56 = vld [vmem:[%s1693_s21 + $0x670] sm:$0xff]  ;;  %v454_v57 = vld [vmem:[%s1693_s21 + $0x698] sm:$0xff] }
 0x107   : > { %1071 = vmatprep.subr.bf16.mxu1 %v1070_v1  ;;  %v1218_v1 = vpack.c.bf16 %v386_v61, %v378_v60  ;;  %v466_v60 = vld [vmem:[%s1693_s21 + $0x6f8] sm:$0xff] }
 0x108   : > { %1197 = vmatpush1.bf16.xpose.msra.mxu0 %v1196_v0  ;;  %v1090_v0 = vpack.c.bf16 %v382_v59, %v374_v58  ;;  %v462_v58 = vld [vmem:[%s1693_s21 + $0x6d8] sm:$0xff] }
 0x109   : > { %1199 = vmatprep.subr.bf16.mxu0 %v1198_v2  ;;  %v373_v2 = vld [vmem:[%s1693_s21 + $0x410] sm:$0xff]  ;;  %v458_v59 = vld [vmem:[%s1693_s21 + $0x6b8] sm:$0xff] }
 0x10a   : > { %v1092_v11 = vpack.c.bf16 %v381_v3, %v373_v2  ;;  %v461_v2 = vld [vmem:[%s1693_s21 + $0x6d0] sm:$0xff] }
 0x10b   : > { %v457_v3 = vld [vmem:[%s1693_s21 + $0x6b0] sm:$0xff] }
 0x10e   : > { %1073 = vmatpush1.bf16.xpose.msra.mxu1 %v1072_v12  ;;  %v1220_v12 = vpack.c.bf16 %v385_v6, %v377_v4  ;;  %v465_v4 = vld [vmem:[%s1693_s21 + $0x6f0] sm:$0xff]  ;;  %v470_v6 = vld [vmem:[%s1693_s21 + $0x718] sm:$0xff] }
 0x10f   : > { %1075 = vmatprep.subr.bf16.mxu1 %v1074_v14  ;;  %v1222_v14 = vpack.c.bf16 %v402_v10, %v394_v9  ;;  %v482_v9 = vld [vmem:[%s1693_s21 + $0x778] sm:$0xff] }
 0x110   : > { %1201 = vmatpush1.bf16.xpose.msra.mxu0 %v1200_v13  ;;  %v1094_v13 = vpack.c.bf16 %v398_v8, %v390_v7  ;;  %v478_v7 = vld [vmem:[%s1693_s21 + $0x758] sm:$0xff] }
 0x111   : > { %1203 = vmatprep.subr.bf16.mxu0 %v1202_v16  ;;  %v389_v16 = vld [vmem:[%s1693_s21 + $0x490] sm:$0xff]  ;;  %v474_v8 = vld [vmem:[%s1693_s21 + $0x738] sm:$0xff] }
 0x112   : > { %v1096_v28 = vpack.c.bf16 %v397_v17, %v389_v16  ;;  %v477_v16 = vld [vmem:[%s1693_s21 + $0x750] sm:$0xff] }
 0x113   : > { %v473_v17 = vld [vmem:[%s1693_s21 + $0x730] sm:$0xff] }
 0x116   : > { %1077 = vmatpush1.bf16.xpose.msra.mxu1 %v1076_v29  ;;  %v1224_v29 = vpack.c.bf16 %v401_v19, %v393_v18  ;;  %v481_v18 = vld [vmem:[%s1693_s21 + $0x770] sm:$0xff]  ;;  %v486_v19 = vld [vmem:[%s1693_s21 + $0x798] sm:$0xff] }
 0x117   : > { %1079 = vmatprep.subr.bf16.mxu1 %v1078_v31  ;;  %v1226_v31 = vpack.c.bf16 %v418_v27, %v410_v26  ;;  %v498_v26 = vld [vmem:[%s1693_s21 + $0x7f8] sm:$0xff] }
 0x118   : > { %1205 = vmatpush1.bf16.xpose.msra.mxu0 %v1204_v30  ;;  %v1098_v30 = vpack.c.bf16 %v414_v25, %v406_v24  ;;  %v494_v24 = vld [vmem:[%s1693_s21 + $0x7d8] sm:$0xff] }
 0x119   : > { %1207 = vmatprep.subr.bf16.mxu0 %v1206_v32  ;;  %v405_v32 = vld [vmem:[%s1693_s21 + $0x510] sm:$0xff]  ;;  %v490_v25 = vld [vmem:[%s1693_s21 + $0x7b8] sm:$0xff] }
 0x11a   : > { %v1100_v40 = vpack.c.bf16 %v413_v33, %v405_v32  ;;  %v493_v32 = vld [vmem:[%s1693_s21 + $0x7d0] sm:$0xff] }
 0x11b   : > { %v489_v33 = vld [vmem:[%s1693_s21 + $0x7b0] sm:$0xff] }
 0x11e   : > { %1081 = vmatpush1.bf16.xpose.msra.mxu1 %v1080_v41  ;;  %v1228_v41 = vpack.c.bf16 %v417_v35, %v409_v34  ;;  %v497_v34 = vld [vmem:[%s1693_s21 + $0x7f0] sm:$0xff] }
 0x11f   : > { %1083 = vmatprep.subr.bf16.mxu1 %v1082_v43  ;;  %v1230_v43 = vpack.c.bf16 %v434_v39, %v426_v20  ;;  %v499_v20 = vld [vmem:[%s210_s4] sm:$0x3]  ;;  %v507_v39 = vsub.s32 1, %v1743_v5 }
 0x120   : > { %1209 = vmatpush1.bf16.xpose.msra.mxu0 %v1208_v42  ;;  %v1102_v42 = vpack.c.bf16 %v430_v37, %v422_v36  ;;  %v1248_v36 = vpack.c.bf16 %v497_v34, %v489_v33  ;;  %v503_v37 = vsub.s32 0, %v1743_v5 }
 0x121   : > { %1211 = vmatprep.subr.bf16.mxu0 %v1210_v44  ;;  %v421_v44 = vld [vmem:[%s1693_s21 + $0x590] sm:$0xff] }
 0x122   : > { %v1104_v21 = vpack.c.bf16 %v429_v45, %v421_v44 }
 0x126   : > { %1085 = vmatpush1.bf16.xpose.msra.mxu1 %v1084_v51  ;;  %v1232_v51 = vpack.c.bf16 %v433_v46, %v425_v15 }
 0x127   : > { %1087 = vmatprep.subr.bf16.mxu1 %v1086_v52  ;;  %v1234_v52 = vpack.c.bf16 %v450_v50, %v442_v49 }
 0x128   : > { %1213 = vmatpush1.bf16.xpose.msra.mxu0 %v1212_v23  ;;  %v1106_v23 = vpack.c.bf16 %v446_v48, %v438_v47 }
 0x129   : > { %1215 = vmatprep.subr.bf16.mxu0 %v1214_v53  ;;  %v437_v53 = vld [vmem:[%s1693_s21 + $0x610] sm:$0xff] }
 0x12a   : > { %v1108_v61 = vpack.c.bf16 %v445_v54, %v437_v53 }
 0x12e   : > { %1089 = vmatpush1.bf16.xpose.msra.mxu1 %v1088_v62  ;;  %v1236_v62 = vpack.c.bf16 %v449_v56, %v441_v55 }
 0x12f   : > { %1091 = vmatprep.subr.bf16.mxu1 %v1090_v0  ;;  %v1238_v0 = vpack.c.bf16 %v466_v60, %v458_v59 }
 0x130   : > { %1217 = vmatpush1.bf16.xpose.msra.mxu0 %v1216_v63  ;;  %v1110_v63 = vpack.c.bf16 %v462_v58, %v454_v57 }
 0x131   : > { %1219 = vmatprep.subr.bf16.mxu0 %v1218_v1  ;;  %v453_v1 = vld [vmem:[%s1693_s21 + $0x690] sm:$0xff] }
 0x132   : > { %v1112_v10 = vpack.c.bf16 %v461_v2, %v453_v1 }
 0x136   : > { %1093 = vmatpush1.bf16.xpose.msra.mxu1 %v1092_v11  ;;  %v1240_v11 = vpack.c.bf16 %v465_v4, %v457_v3 }
 0x137   : > { %1095 = vmatprep.subr.bf16.mxu1 %v1094_v13  ;;  %v1242_v13 = vpack.c.bf16 %v482_v9, %v474_v8 }
 0x138   : > { %1221 = vmatpush1.bf16.xpose.msra.mxu0 %v1220_v12  ;;  %v1114_v12 = vpack.c.bf16 %v478_v7, %v470_v6 }
 0x139   : > { %1223 = vmatprep.subr.bf16.mxu0 %v1222_v14  ;;  %v469_v14 = vld [vmem:[%s1693_s21 + $0x710] sm:$0xff] }
 0x13a   : > { %v1116_v27 = vpack.c.bf16 %v477_v16, %v469_v14 }
 0x13e   : > { %1097 = vmatpush1.bf16.xpose.msra.mxu1 %v1096_v28  ;;  %v1244_v28 = vpack.c.bf16 %v481_v18, %v473_v17 }
 0x13f   : > { %1099 = vmatprep.subr.bf16.mxu1 %v1098_v30  ;;  %v1246_v30 = vpack.c.bf16 %v498_v26, %v490_v25 }
 0x140   : > { %1225 = vmatpush1.bf16.xpose.msra.mxu0 %v1224_v29  ;;  %v1118_v29 = vpack.c.bf16 %v494_v24, %v486_v19 }
 0x141   : > { %1227 = vmatprep.subr.bf16.mxu0 %v1226_v31  ;;  %v485_v31 = vld [vmem:[%s1693_s21 + $0x790] sm:$0xff] }
 0x142   : > { %v1120_v35 = vpack.c.bf16 %v493_v32, %v485_v31 }
 0x146   : > { %1101 = vmatpush1.bf16.xpose.msra.mxu1 %v1100_v40  ;;  %v504_v40 = vrot.slane %v499_v20, %v503_v37 }
 0x147   : > { %1103 = vmatprep.subr.bf16.mxu1 %v1102_v42 }
 0x148   : > { %1229 = vmatpush1.bf16.xpose.msra.mxu0 %v1228_v41  ;;  %v508_v41 = vrot.slane %v499_v20, %v507_v39 }
 0x149   : > { %1231 = vmatprep.subr.bf16.mxu0 %v1230_v43 }
 0x14e   : > { %1105 = vmatpush1.bf16.xpose.msra.mxu1 %v1104_v21 }
 0x14f   : > { %1107 = vmatprep.subr.bf16.mxu1 %v1106_v23 }
 0x150   : > { %1233 = vmatpush1.bf16.xpose.msra.mxu0 %v1232_v51 }
 0x151   : > { %1235 = vmatprep.subr.bf16.mxu0 %v1234_v52 }
 0x156   : > { %1109 = vmatpush1.bf16.xpose.msra.mxu1 %v1108_v61 }
 0x157   : > { %1111 = vmatprep.subr.bf16.mxu1 %v1110_v63 }
 0x158   : > { %1237 = vmatpush1.bf16.xpose.msra.mxu0 %v1236_v62 }
 0x159   : > { %1239 = vmatprep.subr.bf16.mxu0 %v1238_v0 }
 0x15e   : > { %1113 = vmatpush1.bf16.xpose.msra.mxu1 %v1112_v10 }
 0x15f   : > { %1115 = vmatprep.subr.bf16.mxu1 %v1114_v12 }
 0x160   : > { %1241 = vmatpush1.bf16.xpose.msra.mxu0 %v1240_v11 }
 0x161   : > { %1243 = vmatprep.subr.bf16.mxu0 %v1242_v13 }
 0x166   : > { %1117 = vmatpush1.bf16.xpose.msra.mxu1 %v1116_v27 }
 0x167   : > { %1119 = vmatprep.subr.bf16.mxu1 %v1118_v29 }
 0x168   : > { %1245 = vmatpush1.bf16.xpose.msra.mxu0 %v1244_v28 }
 0x169   : > { %1247 = vmatprep.subr.bf16.mxu0 %v1246_v30 }
 0x16e   : > { %1121 = vmatpush1.bf16.xpose.msra.mxu1 %v1120_v35 }
 0x170   : > { %1249 = vmatpush1.bf16.xpose.msra.mxu0 %v1248_v36 }
 0x175   : > { %691 = vmatmul.mubr.f32.vlgmr.msra.gmra.mrb[0].mxu1 %v1863_v38 }
 0x177   : > { %833 = vmatmul.mubr.f32.vlgmr.msra.gmra.mrb[0].mxu0 %v1868_v22 }
 0x248   : > { %v692_v42 = vpop.f32.mrb[0].mxu1 }
 0x249   : > { %v1250_v43 = vadd.f32 %v692_v42, %v504_v40  ;;  %v694_v45 = vpop.f32.mrb[1].mxu1 }
 0x24a   : > { %v834_v44 = vpop.f32.mrb[0].mxu0  ;;  %v1252_v38 = vadd.f32 %v694_v45, %v508_v41 }
 0x24b   : > { %v836_v15 = vpop.f32.mrb[1].mxu0  ;;  %v1251_v22 = vadd.f32 %v1250_v43, %v834_v44 }
 0x24c   : > { %v1253_v46 = vadd.f32 %v1252_v38, %v836_v15 }
 0x24e   : > { %v841_v47 = vcombine.low %v1251_v22, %v1253_v46 }
 0x250   : > { %984 = vst.sshfl [vmem:[%s237_s20] sm:$0x33 pattern:$0x76325410] %v841_v47 }
 0x251   : > { %1426 = shalt.err (!%p1423_p1)
}
 0x252   : > { %s1427_s11 = scalar_lea.hbm %s2002_s7, 64  ;;  %s1431_s9 = scalar_lea.hbm %s2048_s3, 256 }
 0x253   : > { %p1428_p4 = scmp.ne.s32.totalorder %s2002_s7, %s1427_s11  ;;  %p1432_p6 = scmp.lt.u32.totalorder %s2002_s7, %s2048_s3 }
 0x254   : > { %p1433_p3 = scmp.lt.u32.totalorder %s1431_s9, %s1427_s11  ;;  %p1435_p8 = scmp.lt.u32.totalorder %s1427_s11, %s2002_s7 }
 0x255   : > { %p1429_p10 = pnand %p1428_p4, %p2065_p11 }
 0x256   : > { %p1434_p13 = por %p1433_p3, %p1432_p6 }
 0x257   : > { %p1430_p7 = pneg %p1429_p10 }
 0x258   : > { %p1436_p12 = por %p1435_p8, %p1434_p13 }
 0x25a   : > { %p1437_p5 = pnand %p1436_p12, %p1430_p7 }
 0x25c   : > { %1440 = shalt.err (!%p1437_p5)
}
 0x25d   : > { %1266 = dma.vmem_to_hbm [thread:$0]  (%p2065_p11), %s2004_s22, 64, %s2002_s7, %s852_s28  }
 0x25e PF: > { %p1286_p2 = scmp.ge.s32.totalorder %s1483_s15, 2  ;;  %s878_s4 = sand.u32 1, %s1471_s12  }
 0x25f   : > { %p2066_p0 = scmp.ne.s32.totalorder %s2057_s27, 0  ;;  %s879_s6 = scalar_lea.sflag [#allocation4], %s878_s4 }
 0x261   : > { %p1280_p9 = pnand %p1286_p2, %p2066_p0 }
 0x263   : > { %1466 = dma.done.wait (!%p1280_p9), %s879_s6, 64  }
 0x264   : > { %1468 = vsyncadd (!%p1280_p9), %s879_s6, 4294967232  ;;  %p17_p1 = scmp.ge.s32.totalorder %s1533_s16, 6   ;;  %s2067_s12 = smov %s1475_s13 }
 0x265   : > { %s2068_s13 = smov %s1479_s14  ;;  %s2069_s14 = smov %s1543_s19 }
 0x266   : > { %s2070_s15 = smov %s1533_s16  ;;  %19 = sbr.rel (!%p17_p1) target bundleno = 6 (0x6), region = 93 }
 0x26d   :  { %884 = vsyncpa [#allocation3], 1 }
 0x26e   :  { %886 = vsyncpa [#allocation3 + $0x1], 1 }
 0x26f   :  { %887 = vsyncpa [#allocation6], 1 }
 0x270   :  { %889 = vsyncpa [#allocation6 + $0x1], 1 }
 0x271   :  { %890 = vsyncpa [#allocation4], 1 }
 0x272   :  { %892 = vsyncpa [#allocation4 + $0x1], 1 }

</bundles_post_ra>
